<compile_context>
chip_gen: v6e
topology: v6e:2x2x1
jax: 0.10.0
libtpu: 0.0.40
codegen_flags: <defaults>
</compile_context>

<pallas_src>
import jax
import jax.numpy as jnp
from jax.experimental import pallas as pl
from jax.experimental.pallas import tpu as pltpu


# ----------------------------------------------------------------------------
# Pallas kernel: one batch tile, full forward (aggregate -> matmul -> bias)
# ----------------------------------------------------------------------------
def fused_forward_kernel(x_ref, wf_ref, bf_ref, o_ref):
    """x_ref: (TN, N0)  wf_ref: (N2, K)  bf_ref: (1, K)  o_ref: (TN, K)."""
    n0 = x_ref.shape[1]
    n2 = wf_ref.shape[0]
    r = n0 // n2                                   # composed aggregation ratio (8)

    x = x_ref[...]                                 # whole (TN, N0) slab at once
    # Composed FGL0+FGL1 node aggregation: output node o sums inputs
    # {i : i mod N2 == o}.  r lane-aligned slice adds on the VPU (offsets are
    # multiples of 256 -> multiples of 128 lanes), no dense adjacency matmul.
    agg = x[:, 0:n2]
    for j in range(1, r):
        agg = agg + x[:, j * n2:(j + 1) * n2]      # (TN, N2)

    # Folded channel-mix + FC on the MXU, single store of the whole tile.
    o_ref[...] = (jnp.dot(agg, wf_ref[...], preferred_element_type=jnp.float32)
                  + bf_ref[...])


# ----------------------------------------------------------------------------
# Wrapper: grid over batch tiles, weights broadcast via constant index_map
# ----------------------------------------------------------------------------
def smaller_classifier_forward(x, folded, *, row_tile=8):
    """x: (N, in_features) -> logits (N, n_classes)."""
    wf, bf = folded["W"], folded["b"]              # (N2, K), (1, K)
    n, n0 = x.shape
    k = wf.shape[1]

    n_pad = ((n + row_tile - 1) // row_tile) * row_tile
    if n_pad != n:                                 # pad rows to the tile size
        x = jnp.pad(x, ((0, n_pad - n), (0, 0)))

    out = pl.pallas_call(
        fused_forward_kernel,
        out_shape=jax.ShapeDtypeStruct((n_pad, k), jnp.float32),
        grid_spec=pltpu.PrefetchScalarGridSpec(
            num_scalar_prefetch=0,
            grid=(n_pad // row_tile,),
            in_specs=[
                pl.BlockSpec((row_tile, n0), lambda i: (i, 0)),   # x tile
                pl.BlockSpec(wf.shape, lambda i: (0, 0)),         # folded W
                pl.BlockSpec(bf.shape, lambda i: (0, 0)),         # folded b
            ],
            out_specs=pl.BlockSpec((row_tile, k), lambda i: (i, 0)),
        ),
        compiler_params=pltpu.CompilerParams(
            dimension_semantics=("parallel",),     # batch tiles are independent
        ),
    )(x, wf, bf)
    return out[:n]


# ----------------------------------------------------------------------------
# Parameter / adjacency construction (deterministic, synthetic)
# ----------------------------------------------------------------------------
def make_adjacency(n_in, n_out):
    """Deterministic ward-tree stand-in: output node o sum-aggregates input
    nodes {o, o + n_out, o + 2*n_out, ...}.  Dense form is built ONLY for the
    pure-JAX reference."""
    assert n_in % n_out == 0
    parent = jnp.arange(n_in) % n_out
    return (jnp.arange(n_out)[:, None] == parent[None, :]).astype(jnp.float32)


def weight_norm(v, g):
    """w = g * v / ||v||, norm over all dims except dim 0 (PyTorch default)."""
    norm = jnp.sqrt(jnp.sum(v * v, axis=tuple(range(1, v.ndim)), keepdims=True))
    return g * v / norm


def build_params(key, node_sizes, channel_sizes, n_classes):
    params = {"fgl": []}
    n_layers = len(channel_sizes) - 1
    keys = jax.random.split(key, 2 * n_layers + 2)
    k = 0
    for l in range(n_layers):
        cin, cout = channel_sizes[l], channel_sizes[l + 1]
        nin, nout = node_sizes[l], node_sizes[l + 1]
        v = 0.1 * jax.random.normal(keys[k], (cout, cin), jnp.float32); k += 1
        g = jnp.ones((cout, 1), jnp.float32)
        b = 0.01 * jax.random.normal(keys[k], (cout, nout), jnp.float32); k += 1
        params["fgl"].append({
            "A": make_adjacency(nin, nout),   # reference-only dense adjacency
            "W": weight_norm(v, g),
            "b": b,
        })
    # Final weight-normed Linear, kept as (n_classes, C_last, N_last) matching
    # the row-major flatten order of the last FGL activation.
    c_last, n_last = channel_sizes[-1], node_sizes[-1]
    v = 0.02 * jax.random.normal(keys[k], (n_classes, c_last, n_last), jnp.float32); k += 1
    g = jnp.ones((n_classes, 1, 1), jnp.float32)
    params["fc_W"] = weight_norm(v, g)
    params["fc_b"] = 0.01 * jax.random.normal(keys[k], (1, n_classes), jnp.float32)
    return params


def fold_params(params, node_sizes):
    """Host-side exact affine fold (valid because activation{i} is identity).

    z1[n,d,o] = (W1 @ W0)[d,0] * aggX[n,o] + (W1 @ b0_agg + b1)[d,o]
    logits[n,k] = sum_o W_fold[k,o] * aggX[n,o] + b_fold[k]
    """
    l0, l1 = params["fgl"]
    n1, n2 = node_sizes[1], node_sizes[2]
    r1 = n1 // n2
    c1 = l0["W"].shape[0]

    w10 = (l1["W"] @ l0["W"])[:, 0]                           # (C2,)
    b0_agg = l0["b"].reshape(c1, r1, n2).sum(axis=1)          # (C1, N2) interleaved sum
    b_eff = l1["W"] @ b0_agg + l1["b"]                        # (C2, N2)

    fcw = params["fc_W"]                                      # (K, C2, N2)
    w_fold = jnp.einsum("kdo,d->ko", fcw, w10)                # (K, N2)
    b_fold = jnp.einsum("kdo,do->k", fcw, b_eff) + params["fc_b"][0]
    return {"W": w_fold.T, "b": b_fold[None, :]}              # (N2, K), (1, K)


# ----------------------------------------------------------------------------
# Pure-JAX reference (layer-by-layer, dense adjacency + flattened FC weight)
# ----------------------------------------------------------------------------
def reference_forward(x, params):
    cur_z = x[:, None, :]                                    # unsqueeze(1)
    for layer in params["fgl"]:
        agg = jnp.einsum("nci,oi->nco", cur_z, layer["A"])   # node aggregation
        cur_z = jnp.einsum("dc,nco->ndo", layer["W"], agg) + layer["b"][None]
    N = x.shape[0]
    flat = cur_z.reshape(N, -1)                              # view(N, -1)
    fcw2 = params["fc_W"].reshape(params["fc_W"].shape[0], -1)
    return flat @ fcw2.T + params["fc_b"]


# ----------------------------------------------------------------------------
if __name__ == "__main__":
    # Small, self-consistent shapes (in_features scaled down from
    # constants.original_masked_nnz to 2048 for this synthetic test).
    in_features = 2048
    node_sizes = [in_features, 1024, 256]      # SmallerClassifier_2layer
    channel_sizes = [1, 10, 64]
    n_classes = 8                              # len(meta['c2i'])
    batch = 16                                 # 2 parallel grid tiles of 8 rows

    key = jax.random.PRNGKey(0)
    k_x, k_p = jax.random.split(key)
    x = jax.random.normal(k_x, (batch, in_features), jnp.float32)
    params = build_params(k_p, node_sizes, channel_sizes, n_classes)
    folded = fold_params(params, node_sizes)

    out = smaller_classifier_forward(x, folded)
    out = jax.block_until_ready(out)

    ref = reference_forward(x, params)
    assert out.shape == (batch, n_classes)
    assert jnp.allclose(out, ref, rtol=5e-4, atol=5e-4), "mismatch vs reference"

    print("KERNEL_OK")
</pallas_src>

<mosaic_0001>
module attributes {stable_mosaic.version = 11 : i64} {
  func.func @fused_forward_kernel(%arg0: i32, %arg1: memref<8x2048xf32, #tpu.memory_space<vmem>>, %arg2: memref<256x8xf32, #tpu.memory_space<vmem>>, %arg3: memref<1x8xf32, #tpu.memory_space<vmem>>, %arg4: memref<8x8xf32, #tpu.memory_space<vmem>>) attributes {dimension_semantics = [#tpu.dimension_semantics<parallel>], iteration_bounds = array<i64: 2>, scalar_prefetch = 0 : i64, scratch_operands = 0 : i64, tpu.core_type = #tpu.core_type<tc>, window_params = [{transform_indices = @transform_0, window_bounds = array<i64: 8, 2048>}, {pipeline_mode = #tpu.pipeline_mode<synchronous>, transform_indices = @transform_1, window_bounds = array<i64: 256, 8>}, {pipeline_mode = #tpu.pipeline_mode<synchronous>, transform_indices = @transform_2, window_bounds = array<i64: 1, 8>}, {transform_indices = @transform_3, window_bounds = array<i64: 8, 8>}]} {
    %c0 = arith.constant 0 : index
    %c0_0 = arith.constant 0 : index
    %0 = vector.load %arg1[%c0, %c0_0] : memref<8x2048xf32, #tpu.memory_space<vmem>>, vector<8x2048xf32>
    %1 = vector.extract_strided_slice %0 {offsets = [0, 0], sizes = [8, 256], strides = [1, 1]} : vector<8x2048xf32> to vector<8x256xf32>
    %2 = vector.extract_strided_slice %0 {offsets = [0, 256], sizes = [8, 256], strides = [1, 1]} : vector<8x2048xf32> to vector<8x256xf32>
    %3 = arith.addf %1, %2 : vector<8x256xf32>
    %4 = vector.extract_strided_slice %0 {offsets = [0, 512], sizes = [8, 256], strides = [1, 1]} : vector<8x2048xf32> to vector<8x256xf32>
    %5 = arith.addf %3, %4 : vector<8x256xf32>
    %6 = vector.extract_strided_slice %0 {offsets = [0, 768], sizes = [8, 256], strides = [1, 1]} : vector<8x2048xf32> to vector<8x256xf32>
    %7 = arith.addf %5, %6 : vector<8x256xf32>
    %8 = vector.extract_strided_slice %0 {offsets = [0, 1024], sizes = [8, 256], strides = [1, 1]} : vector<8x2048xf32> to vector<8x256xf32>
    %9 = arith.addf %7, %8 : vector<8x256xf32>
    %10 = vector.extract_strided_slice %0 {offsets = [0, 1280], sizes = [8, 256], strides = [1, 1]} : vector<8x2048xf32> to vector<8x256xf32>
    %11 = arith.addf %9, %10 : vector<8x256xf32>
    %12 = vector.extract_strided_slice %0 {offsets = [0, 1536], sizes = [8, 256], strides = [1, 1]} : vector<8x2048xf32> to vector<8x256xf32>
    %13 = arith.addf %11, %12 : vector<8x256xf32>
    %14 = vector.extract_strided_slice %0 {offsets = [0, 1792], sizes = [8, 256], strides = [1, 1]} : vector<8x2048xf32> to vector<8x256xf32>
    %15 = arith.addf %13, %14 : vector<8x256xf32>
    %c0_1 = arith.constant 0 : index
    %c0_2 = arith.constant 0 : index
    %16 = vector.load %arg2[%c0_1, %c0_2] : memref<256x8xf32, #tpu.memory_space<vmem>>, vector<256x8xf32>
    %cst = arith.constant dense<0.000000e+00> : vector<8x8xf32>
    %17 = tpu.matmul %15, %16, %cst {dimension_numbers = #tpu.dot_dimension_numbers<[1], [0], [0], [1], [0, 0, 1, 1], [], []>} : vector<8x256xf32>, vector<256x8xf32>, vector<8x8xf32> -> vector<8x8xf32>
    %c0_3 = arith.constant 0 : index
    %c0_4 = arith.constant 0 : index
    %18 = vector.load %arg3[%c0_3, %c0_4] : memref<1x8xf32, #tpu.memory_space<vmem>>, vector<1x8xf32>
    %19 = vector.broadcast %18 : vector<1x8xf32> to vector<8x8xf32>
    %20 = arith.addf %17, %19 : vector<8x8xf32>
    %c0_5 = arith.constant 0 : index
    %c0_6 = arith.constant 0 : index
    %21 = vector.load %arg4[%c0_5, %c0_6] : memref<8x8xf32, #tpu.memory_space<vmem>>, vector<8x8xf32>
    tpu.vector_store %arg4[%c0_5, %c0_6], %20 {strides = array<i32>} : memref<8x8xf32, #tpu.memory_space<vmem>>, vector<8x8xf32>,
    return
  }
  func.func @transform_0(%arg0: i32) -> (i32, i32) {
    %c0_i32 = arith.constant 0 : i32
    %c0_i32_0 = arith.constant 0 : i32
    return %arg0, %c0_i32 : i32, i32
  }
  func.func @transform_1(%arg0: i32) -> (i32, i32) {
    %c0_i32 = arith.constant 0 : i32
    %c0_i32_0 = arith.constant 0 : i32
    %c0_i32_1 = arith.constant 0 : i32
    return %c0_i32, %c0_i32_0 : i32, i32
  }
  func.func @transform_2(%arg0: i32) -> (i32, i32) {
    %c0_i32 = arith.constant 0 : i32
    %c0_i32_0 = arith.constant 0 : i32
    %c0_i32_1 = arith.constant 0 : i32
    return %c0_i32, %c0_i32_0 : i32, i32
  }
  func.func @transform_3(%arg0: i32) -> (i32, i32) {
    %c0_i32 = arith.constant 0 : i32
    %c0_i32_0 = arith.constant 0 : i32
    return %arg0, %c0_i32 : i32, i32
  }
}

</mosaic_0001>

<bundles_post_ra>
// kernel: tpu_custom_call.1
= control target key start
LH: loop header
LB: loop body
LE: loop exit
PB: predicated region body
PF: predicated region fallthrough
CT: control target
= control target key end

     0   :  { %s446_s12 = smov 0   ;;  %s584_s0 = inlined_call_operand.vmem [shape: f32[16,2048], index: 0, kind: input, shape index: {}]   ;;  %s585_s1 = inlined_call_operand.vmem [shape: f32[256,8], index: 1, kind: input, shape index: {}]   ;;  %s586_s2 = inlined_call_operand.vmem [shape: f32[1,8], index: 2, kind: input, shape index: {}]   ;;  %s587_s3 = inlined_call_operand.vmem [shape: f32[16,8], index: 3, kind: output, shape index: {}]  }
   0x1 LB: > { %s363_s13 = sadd.s32 4294967295, %s424_s12   ;;  %p367_p0 = scmp.ge.s32.totalorder %s424_s12, 1  ;;  %s424_s12 = sphi %s446_s12, %s13_s12  }
   0x2   : > { %p137_p1 = scmp.lt.s32.totalorder %s424_s12, 3 }
   0x4   : > { %p138_p2 = pnand %p367_p0, %p137_p1 }
   0x5   : > { %p160_p3 = scmp.lt.s32.totalorder (!%p138_p2), %s363_s13, 1 }
   0x6   : > { %141 = sbr.rel (%p138_p2) target bundleno = 244 (0xf4), region = 32 }
   0xb   : > { %v230_v0 = vld [vmem:[%s585_s1 + $0xf8] sm:$0xff]  ;;  %v229_v2 = vld [vmem:[%s585_s1 + $0xf0] sm:$0xff]  ;;  %v228_v4 = vld [vmem:[%s585_s1 + $0xe8] sm:$0xff]  ;;  %s589_s13 = smov (!%p160_p3, %s363_s13), 1  ;;  %vm308_vm0 = vcmask 64512  }
   0xc   : > { %v214_v1 = vld [vmem:[%s585_s1 + $0x78] sm:$0xff]  ;;  %375 = vmatprep.subr.mxu0 %v230_v0  ;;  %v213_v3 = vld [vmem:[%s585_s1 + $0x70] sm:$0xff]  ;;  %v212_v5 = vld [vmem:[%s585_s1 + $0x68] sm:$0xff]  ;;  %s374_s28 = sshll.u32 %s589_s13, 7 }
   0xd   : > { %376 = vmatpush3.msra.mxu0 %v214_v1  ;;  %v227_v6 = vld [vmem:[%s585_s1 + $0xe0] sm:$0xff]  ;;  %v226_v8 = vld [vmem:[%s585_s1 + $0xd8] sm:$0xff]  ;;  %s490_s10 = scalar_lea.vmem %s584_s0, %s374_s28  ;;  %v225_v10 = vld [vmem:[%s585_s1 + $0xd0] sm:$0xff] }
   0xe   : > { %377 = vmatprep.subr.mxu0 %v229_v2  ;;  %v211_v7 = vld [vmem:[%s585_s1 + $0x60] sm:$0xff]  ;;  %v210_v9 = vld [vmem:[%s585_s1 + $0x58] sm:$0xff]  ;;  %v209_v11 = vld [vmem:[%s585_s1 + $0x50] sm:$0xff] }
   0xf   : > { %378 = vmatpush3.msra.mxu0 %v213_v3  ;;  %v224_v12 = vld [vmem:[%s585_s1 + $0xc8] sm:$0xff]  ;;  %v172_v15 = vld [vmem:[%s490_s10 + $0x18] sm:$0xff]  ;;  %v223_v17 = vld [vmem:[%s585_s1 + $0xc0] sm:$0xff] }
  0x10   : > { %379 = vmatprep.subr.mxu0 %v228_v4  ;;  %v170_v13 = vld [vmem:[%s490_s10 + $0x8] sm:$0xff]  ;;  %v207_v18 = vld [vmem:[%s585_s1 + $0x40] sm:$0xff]  ;;  %v176_v20 = vld [vmem:[%s490_s10 + $0x38] sm:$0xff] }
  0x11   : > { %380 = vmatpush3.msra.mxu0 %v212_v5  ;;  %v208_v14 = vld [vmem:[%s585_s1 + $0x48] sm:$0xff]  ;;  %v186_v19 = vadd.f32 %v172_v15, %v170_v13  ;;  %v169_v21 = vld [vmem:[%s490_s10] sm:$0xff]  ;;  %v171_v22 = vld [vmem:[%s490_s10 + $0x10] sm:$0xff] }
  0x12   : > { %381 = vmatprep.subr.mxu0 %v227_v6  ;;  %v174_v16 = vld [vmem:[%s490_s10 + $0x28] sm:$0xff]  ;;  %v222_v23 = vld [vmem:[%s585_s1 + $0xb8] sm:$0xff]  ;;  %v173_v25 = vld [vmem:[%s490_s10 + $0x20] sm:$0xff]  ;;  %v185_v26 = vadd.f32 %v171_v22, %v169_v21 }
  0x13   : > { %382 = vmatpush3.msra.mxu0 %v211_v7  ;;  %v188_v24 = vadd.f32 %v186_v19, %v174_v16  ;;  %v206_v27 = vld [vmem:[%s585_s1 + $0x38] sm:$0xff]  ;;  %v178_v28 = vld [vmem:[%s490_s10 + $0x48] sm:$0xff]  ;;  %v175_v29 = vld [vmem:[%s490_s10 + $0x30] sm:$0xff] }
  0x14   : > { %383 = vmatprep.subr.mxu0 %v226_v8  ;;  %v221_v30 = vld [vmem:[%s585_s1 + $0xb0] sm:$0xff]  ;;  %v187_v32 = vadd.f32 %v185_v26, %v173_v25  ;;  %v180_v34 = vld [vmem:[%s490_s10 + $0x58] sm:$0xff]  ;;  %v177_v35 = vld [vmem:[%s490_s10 + $0x40] sm:$0xff] }
  0x15   : > { %384 = vmatpush3.msra.mxu0 %v210_v9  ;;  %v190_v31 = vadd.f32 %v188_v24, %v176_v20  ;;  %v205_v33 = vld [vmem:[%s585_s1 + $0x30] sm:$0xff]  ;;  %v220_v36 = vld [vmem:[%s585_s1 + $0xa8] sm:$0xff]  ;;  %v219_v42 = vld [vmem:[%s585_s1 + $0xa0] sm:$0xff] }
  0x16   : > { %385 = vmatprep.subr.mxu0 %v225_v10  ;;  %v189_v38 = vadd.f32 %v187_v32, %v175_v29  ;;  %v204_v39 = vld [vmem:[%s585_s1 + $0x28] sm:$0xff]  ;;  %v179_v41 = vld [vmem:[%s490_s10 + $0x50] sm:$0xff]  ;;  %v203_v45 = vld [vmem:[%s585_s1 + $0x20] sm:$0xff] }
  0x17   : > { %386 = vmatpush3.msra.mxu0 %v209_v11  ;;  %v192_v37 = vadd.f32 %v190_v31, %v178_v28  ;;  %v182_v40 = vld [vmem:[%s490_s10 + $0x68] sm:$0xff]  ;;  %v184_v46 = vld [vmem:[%s490_s10 + $0x78] sm:$0xff]  ;;  %v181_v49 = vld [vmem:[%s490_s10 + $0x60] sm:$0xff] }
  0x18   : > { %387 = vmatprep.subr.mxu0 %v224_v12  ;;  %v191_v44 = vadd.f32 %v189_v38, %v177_v35  ;;  %v218_v47 = vld [vmem:[%s585_s1 + $0x98] sm:$0xff]  ;;  %v217_v52 = vld [vmem:[%s585_s1 + $0x90] sm:$0xff]  ;;  %v216_v56 = vld [vmem:[%s585_s1 + $0x88] sm:$0xff] }
  0x19   : > { %388 = vmatpush3.msra.mxu0 %v208_v14  ;;  %v194_v43 = vadd.f32 %v192_v37, %v180_v34  ;;  %v202_v51 = vld [vmem:[%s585_s1 + $0x18] sm:$0xff]  ;;  %v201_v54 = vld [vmem:[%s585_s1 + $0x10] sm:$0xff]  ;;  %v200_v58 = vld [vmem:[%s585_s1 + $0x8] sm:$0xff] }
  0x1a   : > { %389 = vmatprep.subr.mxu0 %v223_v17  ;;  %v193_v50 = vadd.f32 %v191_v44, %v179_v41  ;;  %v183_v57 = vld [vmem:[%s490_s10 + $0x70] sm:$0xff]  ;;  %v215_v59 = vld [vmem:[%s585_s1 + $0x80] sm:$0xff]  ;;  %s370_s10 = sshll.u32 %s589_s13, 3 }
  0x1b   : > { %390 = vmatpush3.msra.mxu0 %v207_v18  ;;  %v196_v48 = vadd.f32 %v194_v43, %v182_v40  ;;  %v199_v60 = vld [vmem:[%s585_s1] sm:$0xff]  ;;  %s168_s11 = scalar_lea.vmem %s587_s3, %s370_s10 }
  0x1c   : > { %391 = vmatprep.subr.mxu0 %v222_v23  ;;  %v195_v55 = vadd.f32 %v193_v50, %v181_v49  ;;  %v371_v63 = vld [vmem:[%s586_s2] ss:$0 sm:$0xff] }
  0x1d   : > { %392 = vmatpush3.msra.mxu0 %v206_v27  ;;  %v198_v53 = vadd.f32 %v196_v48, %v184_v46 }
  0x1e   : > { %393 = vmatprep.subr.mxu0 %v221_v30  ;;  %v197_v61 = vadd.f32 %v195_v55, %v183_v57 }
  0x1f   : > { %394 = vmatpush3.msra.mxu0 %v205_v33  ;;  %302 = vmatprep.mubr.f32.mxu0 %v198_v53 }
  0x20   : > { %395 = vmatprep.subr.mxu0 %v220_v36 }
  0x21   : > { %396 = vmatpush3.msra.mxu0 %v204_v39 }
  0x22   : > { %397 = vmatprep.subr.mxu0 %v219_v42 }
  0x23   : > { %398 = vmatpush3.msra.mxu0 %v203_v45 }
  0x24   : > { %399 = vmatprep.subr.mxu0 %v218_v47 }
  0x25   : > { %400 = vmatpush3.msra.mxu0 %v202_v51 }
  0x26   : > { %401 = vmatprep.subr.mxu0 %v217_v52 }
  0x27   : > { %402 = vmatpush3.msra.mxu0 %v201_v54 }
  0x28   : > { %403 = vmatprep.subr.mxu0 %v216_v56 }
  0x29   : > { %404 = vmatpush3.msra.mxu0 %v200_v58 }
  0x2a   : > { %405 = vmatprep.subr.mxu0 %v215_v59 }
  0x2b   : > { %406 = vmatpush3.msra.mxu0 %v199_v60 }
  0x2c   : > { %303 = vmatmul.mubr.f32.vlgmr.msra.gmra.mxu0 %v197_v61 }
  0xec   : > { %v407_v62 = vpop.f32.mrf.mxu0 }
  0xee   : > { %v408_v0 = vpop.f32.mrf.mxu0 }
  0xef   : > { %v409_v1 = vadd.f32 %v408_v0, %v407_v62 }
  0xf1   : > { %v305_v2 = vadd.f32 %v409_v1, %v371_v63 }
  0xf3   : > { %309 = vst.msk [vmem:[%s168_s11] sm:$0xff] %vm308_vm0, %v305_v2 }
  0xf4 PF: > { %s13_s12 = sadd.s32 1, %s424_s12  }
  0xf5   : > { %p10_p4 = scmp.ge.s32.totalorder %s13_s12, 4  }
  0xf7   :  { %12 = sbr.rel (!%p10_p4) target bundleno = 1 (0x1), region = 62 }

</bundles_post_ra>
